<compile_context>
chip_gen: v7x
topology: tpu7x:2x2x1
jax: 0.10.0
libtpu: 0.0.40
codegen_flags: <defaults>
</compile_context>

<pallas_src>
import math

import jax
import jax.numpy as jnp
import numpy as np
from jax.experimental import pallas as pl
from jax.experimental.pallas import tpu as pltpu

# ---- small synthetic config consistent with the module ----
BATCH = 2
SEQ = 8
HIDDEN = 32
INTERMEDIATE = 128          # must be > HIDDEN; chosen 128 so it is lane-dense


def _round_up(x, m):
    return (x + m - 1) // m * m


def mlp_kernel(x_ref, wgu_ref, wd_ref, o_ref):
    """One row-tile of the fused SwiGLU MLP.

    x_ref:   (TM, H)      row tile of hidden states (rows = flattened B*S)
    wgu_ref: (H, 2*I)     [gate | up] projection weights, (in, out) layout
    wd_ref:  (I, H)       down projection weights, (in, out) layout
    o_ref:   (TM, H)      output tile
    """
    inter = wd_ref.shape[0]                       # static

    x = x_ref[...]                                # (TM, H)

    # One MXU matmul covers both gate and up projections (lane-dense 2*I out).
    gu = jnp.dot(x, wgu_ref[...], preferred_element_type=jnp.float32)  # (TM, 2I)
    g = gu[:, :inter]                             # 128-aligned lane slice
    u = gu[:, inter:]

    # SiLU(g) * u : exp goes to the EUP slot, multiplies/adds to the VPU.
    sig = 1.0 / (1.0 + jnp.exp(-g))
    h = (g * sig) * u                             # (TM, I)

    # Down projection (MXU), f32 accumulation.
    o_ref[...] = jnp.dot(h, wd_ref[...],
                         preferred_element_type=jnp.float32).astype(o_ref.dtype)


def mlp(hidden_states, params, *, tm=512):
    """hidden_states: (B, S, H) float32. params hold (in, out)-layout weights."""
    B, S, H = hidden_states.shape
    wg, wu, wd = params["w_gate"], params["w_up"], params["w_down"]
    inter = wg.shape[1]

    # Pre-concatenate gate|up weights -> one wide, lane-dense matmul in-kernel.
    wgu = jnp.concatenate([wg, wu], axis=1)       # (H, 2*I)

    # Fold (B, S) into one row axis; pad rows to a tileable multiple of 8.
    M = B * S
    x2 = hidden_states.reshape(M, H)
    TM = min(tm, _round_up(M, 8))
    Mp = _round_up(M, TM)
    if Mp != M:
        x2 = jnp.pad(x2, ((0, Mp - M), (0, 0)))
    grid = (Mp // TM,)                            # (1,) at the example shapes

    out2 = pl.pallas_call(
        mlp_kernel,
        out_shape=jax.ShapeDtypeStruct((Mp, H), jnp.float32),
        grid_spec=pltpu.PrefetchScalarGridSpec(
            num_scalar_prefetch=0,
            grid=grid,
            in_specs=[
                pl.BlockSpec((TM, H), lambda i: (i, 0)),          # x rows
                pl.BlockSpec((H, 2 * inter), lambda i: (0, 0)),   # [gate|up] W
                pl.BlockSpec((inter, H), lambda i: (0, 0)),       # down W
            ],
            out_specs=pl.BlockSpec((TM, H), lambda i: (i, 0)),
        ),
        compiler_params=pltpu.CompilerParams(
            dimension_semantics=("parallel",)),
    )(x2, wgu, wd)

    return out2[:M].reshape(B, S, H)


def make_params(key):
    """Deterministic synthetic params. Weights stored as (in, out) = nn.Linear weight.T."""
    k0, k1, k2 = jax.random.split(key, 3)
    lim_in = 1.0 / math.sqrt(HIDDEN)
    lim_mid = 1.0 / math.sqrt(INTERMEDIATE)
    w_gate = jax.random.uniform(k0, (HIDDEN, INTERMEDIATE), jnp.float32, -lim_in, lim_in)
    w_up = jax.random.uniform(k1, (HIDDEN, INTERMEDIATE), jnp.float32, -lim_in, lim_in)
    w_down = jax.random.uniform(k2, (INTERMEDIATE, HIDDEN), jnp.float32, -lim_mid, lim_mid)
    return {"w_gate": w_gate, "w_up": w_up, "w_down": w_down}


def reference(hidden_states, params):
    """Pure-JAX reference mirroring the PyTorch forward exactly (dropout p=0)."""
    g = hidden_states @ params["w_gate"]
    u = hidden_states @ params["w_up"]
    h = jax.nn.silu(g) * u
    return h @ params["w_down"]


if __name__ == "__main__":
    key = jax.random.PRNGKey(0)
    kx, kp = jax.random.split(key, 2)
    x = jax.random.normal(kx, (BATCH, SEQ, HIDDEN), dtype=jnp.float32)
    params = make_params(kp)

    out = mlp(x, params)
    out = jax.block_until_ready(out)

    ref = reference(x, params)
    np.testing.assert_allclose(np.asarray(out), np.asarray(ref), rtol=1e-5, atol=1e-5)
    print("KERNEL_OK")
</pallas_src>

<mosaic_0001>
module attributes {stable_mosaic.version = 11 : i64} {
  func.func @mlp_kernel(%arg0: i32, %arg1: memref<16x32xf32, #tpu.memory_space<vmem>>, %arg2: memref<32x256xf32, #tpu.memory_space<vmem>>, %arg3: memref<128x32xf32, #tpu.memory_space<vmem>>, %arg4: memref<16x32xf32, #tpu.memory_space<vmem>>) attributes {dimension_semantics = [#tpu.dimension_semantics<parallel>], iteration_bounds = array<i64: 1>, scalar_prefetch = 0 : i64, scratch_operands = 0 : i64, tpu.core_type = #tpu.core_type<tc>, window_params = [{transform_indices = @transform_0, window_bounds = array<i64: 16, 32>}, {pipeline_mode = #tpu.pipeline_mode<synchronous>, transform_indices = @transform_1, window_bounds = array<i64: 32, 256>}, {pipeline_mode = #tpu.pipeline_mode<synchronous>, transform_indices = @transform_2, window_bounds = array<i64: 128, 32>}, {transform_indices = @transform_3, window_bounds = array<i64: 16, 32>}]} {
    %c0 = arith.constant 0 : index
    %c0_0 = arith.constant 0 : index
    %0 = vector.load %arg1[%c0, %c0_0] : memref<16x32xf32, #tpu.memory_space<vmem>>, vector<16x32xf32>
    %c0_1 = arith.constant 0 : index
    %c0_2 = arith.constant 0 : index
    %1 = vector.load %arg2[%c0_1, %c0_2] : memref<32x256xf32, #tpu.memory_space<vmem>>, vector<32x256xf32>
    %cst = arith.constant dense<0.000000e+00> : vector<16x256xf32>
    %2 = tpu.matmul %0, %1, %cst {dimension_numbers = #tpu.dot_dimension_numbers<[1], [0], [0], [1], [0, 0, 1, 1], [], []>} : vector<16x32xf32>, vector<32x256xf32>, vector<16x256xf32> -> vector<16x256xf32>
    %3 = vector.extract_strided_slice %2 {offsets = [0, 0], sizes = [16, 128], strides = [1, 1]} : vector<16x256xf32> to vector<16x128xf32>
    %4 = vector.extract_strided_slice %2 {offsets = [0, 128], sizes = [16, 128], strides = [1, 1]} : vector<16x256xf32> to vector<16x128xf32>
    %cst_3 = arith.constant 0.000000e+00 : f32
    %5 = vector.broadcast %cst_3 : f32 to vector<16x128xf32>
    %6 = arith.subf %5, %3 : vector<16x128xf32>
    %7 = math.exp %6 : vector<16x128xf32>
    %cst_4 = arith.constant 1.000000e+00 : f32
    %8 = vector.broadcast %cst_4 : f32 to vector<16x128xf32>
    %9 = arith.addf %8, %7 : vector<16x128xf32>
    %cst_5 = arith.constant 1.000000e+00 : f32
    %10 = vector.broadcast %cst_5 : f32 to vector<16x128xf32>
    %11 = arith.divf %10, %9 : vector<16x128xf32>
    %12 = arith.mulf %3, %11 : vector<16x128xf32>
    %13 = arith.mulf %12, %4 : vector<16x128xf32>
    %c0_6 = arith.constant 0 : index
    %c0_7 = arith.constant 0 : index
    %14 = vector.load %arg3[%c0_6, %c0_7] : memref<128x32xf32, #tpu.memory_space<vmem>>, vector<128x32xf32>
    %cst_8 = arith.constant dense<0.000000e+00> : vector<16x32xf32>
    %15 = tpu.matmul %13, %14, %cst_8 {dimension_numbers = #tpu.dot_dimension_numbers<[1], [0], [0], [1], [0, 0, 1, 1], [], []>} : vector<16x128xf32>, vector<128x32xf32>, vector<16x32xf32> -> vector<16x32xf32>
    %c0_9 = arith.constant 0 : index
    %c0_10 = arith.constant 0 : index
    %16 = vector.load %arg4[%c0_9, %c0_10] : memref<16x32xf32, #tpu.memory_space<vmem>>, vector<16x32xf32>
    tpu.vector_store %arg4[%c0_9, %c0_10], %15 {strides = array<i32>} : memref<16x32xf32, #tpu.memory_space<vmem>>, vector<16x32xf32>,
    return
  }
  func.func @transform_0(%arg0: i32) -> (i32, i32) {
    %c0_i32 = arith.constant 0 : i32
    %c0_i32_0 = arith.constant 0 : i32
    return %arg0, %c0_i32 : i32, i32
  }
  func.func @transform_1(%arg0: i32) -> (i32, i32) {
    %c0_i32 = arith.constant 0 : i32
    %c0_i32_0 = arith.constant 0 : i32
    %c0_i32_1 = arith.constant 0 : i32
    return %c0_i32, %c0_i32_0 : i32, i32
  }
  func.func @transform_2(%arg0: i32) -> (i32, i32) {
    %c0_i32 = arith.constant 0 : i32
    %c0_i32_0 = arith.constant 0 : i32
    %c0_i32_1 = arith.constant 0 : i32
    return %c0_i32, %c0_i32_0 : i32, i32
  }
  func.func @transform_3(%arg0: i32) -> (i32, i32) {
    %c0_i32 = arith.constant 0 : i32
    %c0_i32_0 = arith.constant 0 : i32
    return %arg0, %c0_i32 : i32, i32
  }
}

</mosaic_0001>

<bundles_post_ra>
// kernel: tpu_custom_call.1
= control target key start
LH: loop header
LB: loop body
LE: loop exit
PB: predicated region body
PF: predicated region fallthrough
CT: control target
= control target key end

     0   :  { %v365_v7 = vmov 0.0   ;;  %s483_s0 = inlined_call_operand.vmem [shape: f32[16,32], index: 0, kind: input, shape index: {}]   ;;  %s484_s1 = inlined_call_operand.vmem [shape: f32[32,256], index: 1, kind: input, shape index: {}]   ;;  %s485_s2 = inlined_call_operand.vmem [shape: f32[128,32], index: 2, kind: input, shape index: {}]   ;;  %s486_s3 = inlined_call_operand.hbm [shape: f32[16,32], index: 3, kind: output, shape index: {}]  }
   0x1   :  { %v18_v0 = vld [vmem:[%s484_s1 + $0x8] sm:$0xff]  ;;  %v20_v1 = vld [vmem:[%s484_s1 + $0x18] sm:$0xff]  ;;  %v17_v2 = vld [vmem:[%s484_s1] sm:$0xff]  ;;  %96 = vmatprep.mubr.f32.mxu0 %v365_v7 }
   0x2   :  { %v289_v3 = vpack.c.bf16 %v20_v1, %v18_v0  ;;  %v19_v4 = vld [vmem:[%s484_s1 + $0x10] sm:$0xff]  ;;  %v22_v5 = vld [vmem:[%s484_s1 + $0x28] sm:$0xff]  ;;  %v24_v6 = vld [vmem:[%s484_s1 + $0x38] sm:$0xff] }
   0x3   :  { %v291_v8 = vpack.c.bf16 %v19_v4, %v17_v2  ;;  %v293_v9 = vpack.c.bf16 %v24_v6, %v22_v5  ;;  %v21_v10 = vld [vmem:[%s484_s1 + $0x20] sm:$0xff]  ;;  %v23_v11 = vld [vmem:[%s484_s1 + $0x30] sm:$0xff] }
   0x4   :  { %290 = vmatprep.subr.bf16.mxu0 %v289_v3 }
   0x5   :  { %8 = vsyncpa [#allocation3], 0  ;;  %292 = vmatpush1.bf16.msra.mxu0 %v291_v8  ;;  %v295_v12 = vpack.c.bf16 %v23_v11, %v21_v10  ;;  %v15_v13 = vld [vmem:[%s483_s0] sm:$0xff]  ;;  %vm25_vm0 = vcmask 261120   ;;  %v16_v14 = vld [vmem:[%s483_s0 + $0x8] sm:$0xff] }
   0x6   :  { %294 = vmatprep.subr.bf16.mxu0 %v293_v9  ;;  %v125_v15 = vld [vmem:[%s485_s2] sm:$0xff]  ;;  %v126_v16 = vld [vmem:[%s485_s2 + $0x8] sm:$0xff]  ;;  %v127_v18 = vld [vmem:[%s485_s2 + $0x10] sm:$0xff] }
   0x7   :  { %v297_v17 = vpack.c.bf16 %v126_v16, %v125_v15  ;;  %v128_v19 = vld [vmem:[%s485_s2 + $0x18] sm:$0xff]  ;;  %v129_v21 = vld [vmem:[%s485_s2 + $0x20] sm:$0xff]  ;;  %v130_v22 = vld [vmem:[%s485_s2 + $0x28] sm:$0xff] }
   0x8   :  { %v301_v20 = vpack.c.bf16 %v128_v19, %v127_v18  ;;  %v305_v23 = vpack.c.bf16 %v130_v22, %v129_v21  ;;  %v131_v24 = vld [vmem:[%s485_s2 + $0x30] sm:$0xff]  ;;  %v132_v25 = vld [vmem:[%s485_s2 + $0x38] sm:$0xff]  ;;  %v133_v27 = vld [vmem:[%s485_s2 + $0x40] sm:$0xff] }
   0x9   :  { %296 = vmatpush1.bf16.msra.mxu0 %v295_v12  ;;  %298 = vmatprep.subr.bf16.mxu1 %v297_v17  ;;  %v309_v26 = vpack.c.bf16 %v132_v25, %v131_v24  ;;  %v134_v28 = vld [vmem:[%s485_s2 + $0x48] sm:$0xff]  ;;  %v135_v30 = vld [vmem:[%s485_s2 + $0x50] sm:$0xff]  ;;  %v136_v31 = vld [vmem:[%s485_s2 + $0x58] sm:$0xff] }
   0xa   :  { %300 = vmatpush3.bf16.msra.mxu1 %v297_v17  ;;  %v313_v29 = vpack.c.bf16 %v134_v28, %v133_v27  ;;  %v317_v32 = vpack.c.bf16 %v136_v31, %v135_v30  ;;  %v137_v33 = vld [vmem:[%s485_s2 + $0x60] sm:$0xff]  ;;  %v138_v34 = vld [vmem:[%s485_s2 + $0x68] sm:$0xff]  ;;  %v139_v36 = vld [vmem:[%s485_s2 + $0x70] sm:$0xff] }
   0xb   :  { %302 = vmatprep.subr.bf16.mxu1 %v301_v20  ;;  %v321_v35 = vpack.c.bf16 %v138_v34, %v137_v33  ;;  %v140_v37 = vld [vmem:[%s485_s2 + $0x78] sm:$0xff]  ;;  %s366_s2 = smov [#allocation2]  }
   0xc   :  { %234 = vmatmul.mubr.msk.f32.vlgmr.msra.gmra.mrb[0].mxu0 %vm25_vm0, %v15_v13  ;;  %v325_v38 = vpack.c.bf16 %v140_v37, %v139_v36  ;;  %s223_s7 = sshll.u32 %s366_s2, 4  ;;  %s224_s7 = int_to_ptr.vmem [resolvable:$true] %s223_s7 }
   0xd   :  { %102 = vmatprep.mubr.f32.mxu0 %v365_v7  ;;  %s341_s8 = scalar_lea.vmem %s224_s7, 256  ;;  %p346_p1 = scmp.lt.s32.totalorder %s224_s7, %s224_s7 }
   0xe   :  { %304 = vmatpush3.bf16.msra.mxu1 %v301_v20  ;;  %p342_p0 = scmp.ne.s32.totalorder %s224_s7, %s341_s8  ;;  %p347_p2 = scmp.lt.s32.totalorder %s341_s8, %s341_s8 }
   0xf   :  { %306 = vmatprep.subr.bf16.mxu1 %v305_v23 }
  0x10   :  { %235 = vmatmul.mubr.msk.f32.gmra.mrb[2].mxu0 %vm25_vm0, %v16_v14  ;;  %p348_p3 = por %p347_p2, %p346_p1 }
  0x12   :  { %308 = vmatpush3.bf16.msra.mxu1 %v305_v23  ;;  %p349_p4 = pnand %p348_p3, %p342_p0 }
  0x13   :  { %310 = vmatprep.subr.bf16.mxu1 %v309_v26 }
  0x16   :  { %312 = vmatpush3.bf16.msra.mxu1 %v309_v26 }
  0x17   :  { %314 = vmatprep.subr.bf16.mxu1 %v313_v29 }
  0x1a   :  { %316 = vmatpush3.bf16.msra.mxu1 %v313_v29 }
  0x1b   :  { %318 = vmatprep.subr.bf16.mxu1 %v317_v32 }
  0x1e   :  { %320 = vmatpush3.bf16.msra.mxu1 %v317_v32 }
  0x1f   :  { %322 = vmatprep.subr.bf16.mxu1 %v321_v35 }
  0x22   :  { %324 = vmatpush3.bf16.msra.mxu1 %v321_v35 }
  0x23   :  { %326 = vmatprep.subr.bf16.mxu1 %v325_v38 }
  0x26   :  { %328 = vmatpush3.bf16.msra.mxu1 %v325_v38 }
  0xdf   :  { %v98_v39 = vpop.f32.mrb[0].mxu0 }
  0xe0   :  { %v109_v40 = vsub.f32 0.0, %v98_v39  ;;  %v100_v41 = vpop.f32.mrb[1].mxu0 }
  0xe2   :  { %v111_v42 = vmul.f32 1.442695, %v109_v40 }
  0xe3   :  { %v104_v43 = vpop.f32.mrb[2].mxu0 }
  0xe4   :  { %333 = vpow2.f32 %v111_v42  ;;  %v110_v44 = vsub.f32 0.0, %v104_v43  ;;  %v106_v45 = vpop.f32.mrb[3].mxu0 }
  0xe6   :  { %v113_v46 = vmul.f32 1.442695, %v110_v44 }
  0xe8   :  { %335 = vpow2.f32 %v113_v46 }
  0xee   :  { %v334_v47 = vpop.eup %333 }
  0xef   :  { %v115_v48 = vadd.f32 1.0, %v334_v47 }
  0xf1   :  { %337 = vrcp.f32 %v115_v48 }
  0xf2   :  { %v336_v49 = vpop.eup %335 }
  0xf3   :  { %v116_v50 = vadd.f32 1.0, %v336_v49 }
  0xf5   :  { %339 = vrcp.f32 %v116_v50 }
  0xfb   :  { %v338_v51 = vpop.eup %337 }
  0xfc   :  { %v121_v52 = vmul.f32 %v338_v51, %v98_v39 }
  0xfe   :  { %v123_v53 = vmul.f32 %v121_v52, %v100_v41 }
  0xff   :  { %v340_v54 = vpop.eup %339 }
 0x100   :  { %v122_v55 = vmul.f32 %v340_v54, %v104_v43  ;;  %286 = vmatprep.mubr.f32.mxu1 %v123_v53 }
 0x102   :  { %v124_v56 = vmul.f32 %v122_v55, %v106_v45 }
 0x104   :  { %287 = vmatmul.mubr.f32.vlgmr.msra.gmra.mrb[0].mxu1 %v124_v56 }
 0x1d7   :  { %v288_v57 = vpop.f32.mrb[0].mxu1 }
 0x1d8   :  { %217 = vst.msk [vmem:[#allocation2 + $0x8] sm:$0xff] %vm25_vm0, %v288_v57  ;;  %v207_v58 = vpop.f32.mrb[1].mxu1 }
 0x1d9   :  { %216 = vst.msk [vmem:[#allocation2] sm:$0xff] %vm25_vm0, %v207_v58 }
 0x1da   :  { %352 = shalt.err (!%p349_p4)
}
 0x1db   :  { %s353_s11 = scalar_lea.hbm %s486_s3, 256 }
 0x1dc   :  { %p354_p5 = scmp.ne.s32.totalorder %s486_s3, %s353_s11  ;;  %p357_p6 = scmp.lt.u32.totalorder %s353_s11, %s486_s3 }
 0x1de   :  { %p359_p7 = pnand %p357_p6, %p354_p5 }
 0x1e0   :  { %362 = shalt.err (!%p359_p7)
}
 0x1e1   :  { %s367_s15 = smov 128   ;;  %s368_s16 = smov 8  }
 0x1e2   :  { %229 = dma.vmem_to_hbm [thread:$0]  %s224_s7, 256, %s486_s3, [#allocation3], %s367_s15, %s367_s15, %s368_s16  }
 0x1e3   :  { %363 = dma.done.wait [#allocation3], 256  }
 0x1e4   :  { %364 = vsyncadd [#allocation3], 4294967040 }
 0x1e5   :  { %233 = vsyncpa [#allocation3], 1 }

</bundles_post_ra>
